<compile_context>
chip_gen: v5e
topology: v5e:2x2
jax: 0.10.0
libtpu: 0.0.40
codegen_flags: <defaults>
</compile_context>

<pallas_src>
import functools
import math

import jax
import jax.numpy as jnp
import numpy as np
from jax.experimental import pallas as pl
from jax.experimental.pallas import tpu as pltpu

_LOG_EPS = float(np.log(1e-8))       # log of torch's clamp(min=1e-8)
_TARGET_STEP_BYTES = 4 << 20         # combined streamed input bytes per grid step
_MAX_TM = 32768                      # cap on column tile (bounds unroll / temps)


# ----------------------------------------------------------------------------
# Kernel
# ----------------------------------------------------------------------------
def _fold_lanes(x, w):
    """Pairwise-tree fold of a (tr, tm) value into (tr, w); tm % w == 0."""
    n = x.shape[-1] // w
    chunks = [x[:, i * w:(i + 1) * w] for i in range(n)]
    while len(chunks) > 1:
        nxt = [chunks[i] + chunks[i + 1] for i in range(0, len(chunks) - 1, 2)]
        if len(chunks) % 2:
            nxt.append(chunks[-1])
        chunks = nxt
    return chunks[0]


def _wbce_kernel(*refs, has_w, has_v, lane_w, total_cols, need_mask):
    """Accumulates lane-wide partial sums of the weighted BCE for one tile."""
    need_denom = has_w or has_v
    it = iter(refs)
    pred_ref = next(it)
    gt_ref = next(it)
    w_ref = next(it) if has_w else None
    v_ref = next(it) if has_v else None
    loss_ref = next(it)
    denom_ref = next(it) if need_denom else None

    m = pl.program_id(1)

    p = pred_ref[...].astype(jnp.float32)
    g = gt_ref[...].astype(jnp.float32)

    # log(sigmoid(p))     = -softplus(-p) = p - softplus(p)
    # log(1 - sigmoid(p)) = -softplus(p)
    # torch's clamp(.., min=1e-8) before the log == max(log_*, log(1e-8)).
    sp_pos = jnp.maximum(p, 0.0) + jnp.log(1.0 + jnp.exp(-jnp.abs(p)))
    log_fg = jnp.maximum(p - sp_pos, _LOG_EPS)
    log_bg = jnp.maximum(-sp_pos, _LOG_EPS)
    # -(log_fg*g + log_bg*(1-g)) rewritten to drop the (1-g) temp + one mul.
    loss = -(g * (log_fg - log_bg) + log_bg)

    wv = None
    if has_w:
        wv = w_ref[...].astype(jnp.float32)
    if has_v:
        v = v_ref[...].astype(jnp.float32)
        wv = v if wv is None else wv * v
    if wv is not None:
        loss = loss * wv

    if need_mask:
        tm = loss.shape[-1]
        col = m * tm + jax.lax.broadcasted_iota(jnp.int32, loss.shape, 1)
        valid = col < total_cols
        loss = jnp.where(valid, loss, 0.0)
        if need_denom:
            wv = jnp.where(valid, wv, 0.0)

    @pl.when(m == 0)
    def _init():
        loss_ref[...] = jnp.zeros_like(loss_ref)
        if need_denom:
            denom_ref[...] = jnp.zeros_like(denom_ref)

    loss_ref[...] += _fold_lanes(loss, lane_w)
    if need_denom:
        denom_ref[...] += _fold_lanes(wv, lane_w)


# ----------------------------------------------------------------------------
# Layout / tiling heuristics (trace-time Python)
# ----------------------------------------------------------------------------
def _divisors(n):
    small = [d for d in range(1, int(math.isqrt(n)) + 1) if n % d == 0]
    return sorted(set(small + [n // d for d in small]))


def _choose_layout(B, N, tr_target):
    """View (B, N) as (B*k, N//k): full sublanes, >=2 row blocks for v7x."""
    best_k, best_score = 1, None
    for k in _divisors(N):
        R, M = B * k, N // k
        sublane_ok = (R % tr_target == 0)
        blocks = (R // tr_target) if sublane_ok else 0
        score = (
            sublane_ok,                         # rows fill the packed sublanes
            M >= 128,                           # at least one full lane tile
            M % 128 == 0,                       # no lane-tail masking needed
            blocks >= 2,                        # both v7x TensorCores busy
            blocks >= 2 and blocks % 2 == 0,    # balanced 2-way core split
            -k,                                 # otherwise keep rows long
        )
        if best_score is None or score > best_score:
            best_score, best_k = score, k
    k = best_k
    return B * k, N // k, k


def _choose_tiles(R, M, bytes_per_col_row, tr_target, target_step_bytes):
    """Row/column tile: row tile matches packing; column tile by step bytes."""
    if R % tr_target == 0:
        tr = tr_target
    elif R % 8 == 0:
        tr = 8
    else:
        tr = R                                  # full-extent rows (always legal)
    if M < 128:
        return tr, M                            # full-extent lanes (always legal)
    tm = (target_step_bytes // max(tr * bytes_per_col_row, 1)) // 128 * 128
    tm = max(128, min(tm, _MAX_TM, pl.cdiv(M, 128) * 128))
    # Prefer a 128-multiple that divides M exactly (skip tail masking) if one
    # exists within 2x of the bandwidth-optimal size.
    if M % 128 == 0 and M % tm != 0:
        for cand in range(tm, max(tm // 2, 128) - 1, -128):
            if M % cand == 0:
                tm = cand
                break
    return tr, tm


def _vmem_limit_bytes(tr, tm, lane_w, stream_itemsizes, need_denom):
    in_step = tr * tm * sum(stream_itemsizes)          # one buffer of all inputs
    temps = 8 * tr * tm * 4                            # f32 elementwise temps
    outs = (2 if need_denom else 1) * 2 * tr * lane_w * 4
    est = 2 * in_step + temps + outs                   # 2x: double-buffered DMA
    return int(min(max(int(est * 1.5) + (2 << 20), 16 << 20), 64 << 20))


# ----------------------------------------------------------------------------
# pallas_call wrapper
# ----------------------------------------------------------------------------
def _wbce_partial_sums(inputs, has_w, has_v, tr, tm, lane_w, vmem_limit):
    R, M = inputs[0].shape
    need_denom = has_w or has_v
    grid = (R // tr, pl.cdiv(M, tm))
    need_mask = (M % tm != 0)

    in_specs = [pl.BlockSpec((tr, tm), lambda r, m: (r, m)) for _ in inputs]
    out_spec = pl.BlockSpec((tr, lane_w), lambda r, m: (r, 0))
    out_shape = [jax.ShapeDtypeStruct((R, lane_w), jnp.float32)]
    out_specs = [out_spec]
    if need_denom:
        out_shape.append(jax.ShapeDtypeStruct((R, lane_w), jnp.float32))
        out_specs.append(out_spec)

    kernel = functools.partial(_wbce_kernel, has_w=has_w, has_v=has_v,
                               lane_w=lane_w, total_cols=M, need_mask=need_mask)
    outs = pl.pallas_call(
        kernel,
        out_shape=tuple(out_shape),
        grid_spec=pltpu.PrefetchScalarGridSpec(
            num_scalar_prefetch=0,
            grid=grid,
            in_specs=in_specs,
            out_specs=out_specs,
        ),
        compiler_params=pltpu.CompilerParams(
            dimension_semantics=("parallel", "arbitrary"),
            vmem_limit_bytes=vmem_limit),
    )(*inputs)
    if need_denom:
        return outs[0], outs[1]
    return outs[0], None


def weighted_bce_with_sigmoid(pred, gt, weight=None, valid_masks=None,
                              reduction="mean", smooth=0.0,
                              target_step_bytes=_TARGET_STEP_BYTES):
    """JAX/Pallas equivalent of Weighted_BCELossWithSigmoid.forward.

    pred, gt, weight, valid_masks: (B, 1, H, W) (NCHW, C == 1).
    """
    if reduction not in ("none", "mean", "sum"):
        raise ValueError("Wrong mode for reduction")
    assert 0 <= smooth < 1, "smooth value should be in [0,1]"
    # NOTE: `smooth` is never used in the reference forward pass.
    assert pred.shape[0] == gt.shape[0]

    B = pred.shape[0]
    N = int(np.prod(pred.shape[1:]))
    has_w = weight is not None
    has_v = valid_masks is not None

    streams = [pred, gt]
    if has_w:
        streams.append(weight)
    if has_v:
        streams.append(valid_masks)
    itemsizes = [jnp.dtype(a.dtype).itemsize for a in streams]

    # Row tile matched to the packed sublane tiling of the narrowest stream
    # (8 for 32-bit, 16 for 16-bit, 32 for 8-bit).
    tr_target = 8 * max(1, 4 // max(min(itemsizes), 1))

    R, M, k = _choose_layout(B, N, tr_target)
    tr, tm = _choose_tiles(R, M, sum(itemsizes), tr_target, target_step_bytes)
    lane_w = min(tm, 128)
    vmem_limit = _vmem_limit_bytes(tr, tm, lane_w, itemsizes, has_w or has_v)

    inputs = [a.reshape(R, M) for a in streams]
    loss_part, denom_part = _wbce_partial_sums(
        inputs, has_w, has_v, tr, tm, lane_w, vmem_limit)

    # Finish the (cheap) lane + row reduction outside the kernel.
    loss_per_batch = loss_part.reshape(B, k * lane_w).sum(axis=1)       # (B,)

    if reduction == "none":
        # torch: loss.view(B, -1).mean(1)
        return loss_per_batch / jnp.float32(N)
    if reduction == "sum":
        return jnp.sum(loss_per_batch)
    # reduction == "mean"
    total_loss = jnp.sum(loss_per_batch)
    if has_w or has_v:
        # denom_part already holds row sums of weight*valid with ones implied
        # for whichever operand was None -> matches all three torch branches.
        denom = jnp.maximum(jnp.sum(denom_part), 1e-8)
        return jnp.minimum(total_loss / denom, 100.0)
    return jnp.minimum(total_loss / jnp.float32(B * N) * 10.0, 100.0)


# ----------------------------------------------------------------------------
# Pure-JAX reference (mirrors the PyTorch module) for verification
# ----------------------------------------------------------------------------
def _reference(pred, gt, weight=None, valid_masks=None, reduction="mean"):
    B = pred.shape[0]
    pred = pred.astype(jnp.float32)
    gt = gt.astype(jnp.float32)
    weight = None if weight is None else weight.astype(jnp.float32)
    valid_masks = None if valid_masks is None else valid_masks.astype(jnp.float32)
    s = jax.nn.sigmoid(pred)
    log_fg = jnp.log(jnp.maximum(s, 1e-8))
    log_bg = jnp.log(jnp.maximum(1.0 - s, 1e-8))
    loss = -(log_fg * gt + log_bg * (1.0 - gt))
    if weight is not None:
        loss = loss * weight
    if valid_masks is not None:
        loss = loss * valid_masks
    if reduction == "none":
        return loss.reshape(B, -1).mean(1)
    if reduction == "sum":
        return loss.sum()
    if weight is not None and valid_masks is not None:
        return jnp.minimum(loss.sum() / jnp.maximum((weight * valid_masks).sum(), 1e-8), 100.0)
    if weight is None and valid_masks is not None:
        return jnp.minimum(loss.sum() / jnp.maximum(valid_masks.sum(), 1e-8), 100.0)
    if weight is not None and valid_masks is None:
        return jnp.minimum(loss.sum() / jnp.maximum(weight.sum(), 1e-8), 100.0)
    return jnp.minimum(loss.mean() * 10.0, 100.0)


if __name__ == "__main__":
    root = jax.random.PRNGKey(0)

    def make_inputs(B, H, W, key, mask_dtype=jnp.float32):
        k1, k2, k3, k4 = jax.random.split(key, 4)
        pred = jax.random.normal(k1, (B, 1, H, W), jnp.float32) * 2.0
        gt = (jax.random.uniform(k2, (B, 1, H, W)) > 0.5).astype(mask_dtype)
        weight = (jax.random.uniform(k3, (B, 1, H, W), jnp.float32) + 0.5).astype(mask_dtype)
        valid = (jax.random.uniform(k4, (B, 1, H, W)) > 0.2).astype(mask_dtype)
        return pred, gt, weight, valid

    def check(out, ref):
        np.testing.assert_allclose(np.asarray(out), np.asarray(ref),
                                   rtol=1e-5, atol=2e-5)

    keys = jax.random.split(root, 6)

    # 1) Small f32 shape, all reduction / operand combinations.
    pred, gt, weight, valid = make_inputs(2, 16, 16, keys[0])
    for cfg in [dict(reduction="mean", weight=weight, valid_masks=valid),
                dict(reduction="mean", weight=None, valid_masks=valid),
                dict(reduction="mean", weight=weight, valid_masks=None),
                dict(reduction="mean", weight=None, valid_masks=None),
                dict(reduction="sum", weight=weight, valid_masks=valid),
                dict(reduction="none", weight=weight, valid_masks=valid)]:
        out = jax.block_until_ready(weighted_bce_with_sigmoid(pred, gt, **cfg))
        check(out, _reference(pred, gt, **cfg))

    # 2) Larger batches -> >=2 "parallel" row blocks (v7x megacore path).
    for B, kk in [(8, keys[1]), (16, keys[2])]:
        pred, gt, weight, valid = make_inputs(B, 16, 16, kk)
        for cfg in [dict(reduction="mean", weight=weight, valid_masks=valid),
                    dict(reduction="mean", weight=None, valid_masks=None)]:
            out = jax.block_until_ready(weighted_bce_with_sigmoid(pred, gt, **cfg))
            check(out, _reference(pred, gt, **cfg))

    # 3) Force a multi-step column grid (accumulation across the "arbitrary"
    #    axis with the lane-wide resident accumulator).
    pred, gt, weight, valid = make_inputs(16, 16, 16, keys[3])
    out = jax.block_until_ready(
        weighted_bce_with_sigmoid(pred, gt, weight=weight, valid_masks=valid,
                                  reduction="mean",
                                  target_step_bytes=8 * 16 * 128))
    check(out, _reference(pred, gt, weight=weight, valid_masks=valid,
                          reduction="mean"))

    # 4) Lane-tail masking: columns not a multiple of 128.
    pred, gt, weight, valid = make_inputs(2, 24, 40, keys[4])
    for cfg in [dict(reduction="mean", weight=weight, valid_masks=valid),
                dict(reduction="mean", weight=None, valid_masks=None)]:
        out = jax.block_until_ready(
            weighted_bce_with_sigmoid(pred, gt, target_step_bytes=8 * 16 * 128,
                                      **cfg))
        check(out, _reference(pred, gt, **cfg))

    # 5) Sub-32-bit masks (bf16 gt/weight/valid) -> packed row tile tr=16.
    pred, gt, weight, valid = make_inputs(2, 16, 64, keys[5],
                                          mask_dtype=jnp.bfloat16)
    out = jax.block_until_ready(
        weighted_bce_with_sigmoid(pred, gt, weight=weight, valid_masks=valid,
                                  reduction="mean"))
    check(out, _reference(pred, gt, weight=weight, valid_masks=valid,
                          reduction="mean"))

    print("KERNEL_OK")
</pallas_src>

<mosaic_0001>
module attributes {stable_mosaic.version = 11 : i64} {
  func.func @_wbce_kernel(%arg0: i32, %arg1: i32, %arg2: memref<8x32xf32, #tpu.memory_space<vmem>>, %arg3: memref<8x32xf32, #tpu.memory_space<vmem>>, %arg4: memref<8x32xf32, #tpu.memory_space<vmem>>, %arg5: memref<8x32xf32, #tpu.memory_space<vmem>>, %arg6: memref<8x32xf32, #tpu.memory_space<vmem>>, %arg7: memref<8x32xf32, #tpu.memory_space<vmem>>) attributes {dimension_semantics = [#tpu.dimension_semantics<parallel>, #tpu.dimension_semantics<arbitrary>], iteration_bounds = array<i64: 2, 1>, scalar_prefetch = 0 : i64, scratch_operands = 0 : i64, tpu.core_type = #tpu.core_type<tc>, window_params = [{transform_indices = @transform_0, window_bounds = array<i64: 8, 32>}, {transform_indices = @transform_1, window_bounds = array<i64: 8, 32>}, {transform_indices = @transform_2, window_bounds = array<i64: 8, 32>}, {transform_indices = @transform_3, window_bounds = array<i64: 8, 32>}, {transform_indices = @transform_4, window_bounds = array<i64: 8, 32>}, {transform_indices = @transform_5, window_bounds = array<i64: 8, 32>}]} {
    %c0 = arith.constant 0 : index
    %c0_0 = arith.constant 0 : index
    %0 = vector.load %arg2[%c0, %c0_0] : memref<8x32xf32, #tpu.memory_space<vmem>>, vector<8x32xf32>
    %c0_1 = arith.constant 0 : index
    %c0_2 = arith.constant 0 : index
    %1 = vector.load %arg3[%c0_1, %c0_2] : memref<8x32xf32, #tpu.memory_space<vmem>>, vector<8x32xf32>
    %cst = arith.constant 0.000000e+00 : f32
    %2 = vector.broadcast %cst : f32 to vector<8x32xf32>
    %3 = arith.maximumf %0, %2 : vector<8x32xf32>
    %4 = math.absf %0 : vector<8x32xf32>
    %cst_3 = arith.constant 0.000000e+00 : f32
    %5 = vector.broadcast %cst_3 : f32 to vector<8x32xf32>
    %6 = arith.subf %5, %4 : vector<8x32xf32>
    %7 = math.exp %6 : vector<8x32xf32>
    %cst_4 = arith.constant 1.000000e+00 : f32
    %8 = vector.broadcast %cst_4 : f32 to vector<8x32xf32>
    %9 = arith.addf %8, %7 : vector<8x32xf32>
    %10 = math.log %9 : vector<8x32xf32>
    %11 = arith.addf %3, %10 : vector<8x32xf32>
    %12 = arith.subf %0, %11 : vector<8x32xf32>
    %cst_5 = arith.constant -18.420681 : f32
    %13 = vector.broadcast %cst_5 : f32 to vector<8x32xf32>
    %14 = arith.maximumf %12, %13 : vector<8x32xf32>
    %cst_6 = arith.constant 0.000000e+00 : f32
    %15 = vector.broadcast %cst_6 : f32 to vector<8x32xf32>
    %16 = arith.subf %15, %11 : vector<8x32xf32>
    %cst_7 = arith.constant -18.420681 : f32
    %17 = vector.broadcast %cst_7 : f32 to vector<8x32xf32>
    %18 = arith.maximumf %16, %17 : vector<8x32xf32>
    %19 = arith.subf %14, %18 : vector<8x32xf32>
    %20 = arith.mulf %1, %19 : vector<8x32xf32>
    %21 = arith.addf %20, %18 : vector<8x32xf32>
    %cst_8 = arith.constant 0.000000e+00 : f32
    %22 = vector.broadcast %cst_8 : f32 to vector<8x32xf32>
    %23 = arith.subf %22, %21 : vector<8x32xf32>
    %c0_9 = arith.constant 0 : index
    %c0_10 = arith.constant 0 : index
    %24 = vector.load %arg4[%c0_9, %c0_10] : memref<8x32xf32, #tpu.memory_space<vmem>>, vector<8x32xf32>
    %c0_11 = arith.constant 0 : index
    %c0_12 = arith.constant 0 : index
    %25 = vector.load %arg5[%c0_11, %c0_12] : memref<8x32xf32, #tpu.memory_space<vmem>>, vector<8x32xf32>
    %26 = arith.mulf %24, %25 : vector<8x32xf32>
    %27 = arith.mulf %23, %26 : vector<8x32xf32>
    %c0_i32 = arith.constant 0 : i32
    %28 = arith.cmpi eq, %arg1, %c0_i32 : i32
    %29 = arith.extui %28 : i1 to i32
    %c0_i32_13 = arith.constant 0 : i32
    %30 = arith.cmpi ne, %29, %c0_i32_13 : i32
    scf.if %30 {
      %cst_22 = arith.constant 0.000000e+00 : f32
      %37 = vector.broadcast %cst_22 : f32 to vector<8x32xf32>
      %c0_23 = arith.constant 0 : index
      %c0_24 = arith.constant 0 : index
      %38 = vector.load %arg6[%c0_23, %c0_24] : memref<8x32xf32, #tpu.memory_space<vmem>>, vector<8x32xf32>
      tpu.vector_store %arg6[%c0_23, %c0_24], %37 {strides = array<i32>} : memref<8x32xf32, #tpu.memory_space<vmem>>, vector<8x32xf32>,
      %cst_25 = arith.constant 0.000000e+00 : f32
      %39 = vector.broadcast %cst_25 : f32 to vector<8x32xf32>
      %c0_26 = arith.constant 0 : index
      %c0_27 = arith.constant 0 : index
      %40 = vector.load %arg7[%c0_26, %c0_27] : memref<8x32xf32, #tpu.memory_space<vmem>>, vector<8x32xf32>
      tpu.vector_store %arg7[%c0_26, %c0_27], %39 {strides = array<i32>} : memref<8x32xf32, #tpu.memory_space<vmem>>, vector<8x32xf32>,
    } else {
    }
    %c0_14 = arith.constant 0 : index
    %c0_15 = arith.constant 0 : index
    %31 = vector.load %arg6[%c0_14, %c0_15] : memref<8x32xf32, #tpu.memory_space<vmem>>, vector<8x32xf32>
    %32 = arith.addf %31, %27 : vector<8x32xf32>
    %c0_16 = arith.constant 0 : index
    %c0_17 = arith.constant 0 : index
    %33 = vector.load %arg6[%c0_16, %c0_17] : memref<8x32xf32, #tpu.memory_space<vmem>>, vector<8x32xf32>
    tpu.vector_store %arg6[%c0_16, %c0_17], %32 {strides = array<i32>} : memref<8x32xf32, #tpu.memory_space<vmem>>, vector<8x32xf32>,
    %c0_18 = arith.constant 0 : index
    %c0_19 = arith.constant 0 : index
    %34 = vector.load %arg7[%c0_18, %c0_19] : memref<8x32xf32, #tpu.memory_space<vmem>>, vector<8x32xf32>
    %35 = arith.addf %34, %26 : vector<8x32xf32>
    %c0_20 = arith.constant 0 : index
    %c0_21 = arith.constant 0 : index
    %36 = vector.load %arg7[%c0_20, %c0_21] : memref<8x32xf32, #tpu.memory_space<vmem>>, vector<8x32xf32>
    tpu.vector_store %arg7[%c0_20, %c0_21], %35 {strides = array<i32>} : memref<8x32xf32, #tpu.memory_space<vmem>>, vector<8x32xf32>,
    return
  }
  func.func @transform_0(%arg0: i32, %arg1: i32) -> (i32, i32) {
    %c0_i32 = arith.constant 0 : i32
    return %arg0, %arg1 : i32, i32
  }
  func.func @transform_1(%arg0: i32, %arg1: i32) -> (i32, i32) {
    %c0_i32 = arith.constant 0 : i32
    return %arg0, %arg1 : i32, i32
  }
  func.func @transform_2(%arg0: i32, %arg1: i32) -> (i32, i32) {
    %c0_i32 = arith.constant 0 : i32
    return %arg0, %arg1 : i32, i32
  }
  func.func @transform_3(%arg0: i32, %arg1: i32) -> (i32, i32) {
    %c0_i32 = arith.constant 0 : i32
    return %arg0, %arg1 : i32, i32
  }
  func.func @transform_4(%arg0: i32, %arg1: i32) -> (i32, i32) {
    %c0_i32 = arith.constant 0 : i32
    %c0_i32_0 = arith.constant 0 : i32
    return %arg0, %c0_i32 : i32, i32
  }
  func.func @transform_5(%arg0: i32, %arg1: i32) -> (i32, i32) {
    %c0_i32 = arith.constant 0 : i32
    %c0_i32_0 = arith.constant 0 : i32
    return %arg0, %c0_i32 : i32, i32
  }
}

</mosaic_0001>

<bundles_post_ra>
// kernel: tpu_custom_call.1
= control target key start
LH: loop header
LB: loop body
LE: loop exit
PB: predicated region body
PF: predicated region fallthrough
CT: control target
= control target key end

     0   :  { %s1248_s0 = inlined_call_operand.hbm [shape: f32[16,32], index: 0, kind: input, shape index: {}]   ;;  %s1249_s1 = inlined_call_operand.hbm [shape: f32[16,32], index: 1, kind: input, shape index: {}]   ;;  %s1250_s2 = inlined_call_operand.hbm [shape: f32[16,32], index: 2, kind: input, shape index: {}]   ;;  %s1251_s3 = inlined_call_operand.hbm [shape: f32[16,32], index: 3, kind: input, shape index: {}]   ;;  %s1252_s4 = inlined_call_operand.hbm [shape: f32[16,32], index: 4, kind: output, shape index: {0}]   ;;  %s1253_s5 = inlined_call_operand.hbm [shape: f32[16,32], index: 5, kind: output, shape index: {1}]  }
   0x1   :  { %1260 = sst [smem:[#allocation24_spill]] %s1248_s0 }
   0x2   :  { %1261 = sst [smem:[#allocation25_spill]] %s1249_s1 }
   0x3   :  { %11 = vsyncpa [#allocation3], 0 }
   0x4   :  { %13 = vsyncpa [#allocation3 + $0x1], 0 }
   0x5   :  { %14 = vsyncpa [#allocation6], 0 }
   0x6   :  { %16 = vsyncpa [#allocation6 + $0x1], 0 }
   0x7   :  { %17 = vsyncpa [#allocation9], 0 }
   0x8   :  { %19 = vsyncpa [#allocation9 + $0x1], 0 }
   0x9   :  { %20 = vsyncpa [#allocation4], 0 }
   0xa   :  { %22 = vsyncpa [#allocation4 + $0x1], 0 }
   0xb   :  { %23 = vsyncpa [#allocation12], 0 }
   0xc   :  { %25 = vsyncpa [#allocation12 + $0x1], 0  ;;  %s1031_s18 = smov 0   ;;  %s1033_s19 = smov 0  }
   0xd   :  { %s1035_s20 = smov 0   ;;  %s1037_s21 = smov 0  }
   0xe   :  { %s1039_s22 = smov 0   ;;  %s1041_s23 = smov 0  }
   0xf LB: > { %1262 = sst [smem:[#allocation18_spill]] %s986_s20  ;;  %s1062_s24 = sadd.s32 4294967295, %s998_s23   ;;  %s998_s23 = sphi %s1041_s23, %s31_s23   ;;  %s994_s22 = sphi %s1039_s22, %s1281_s22   ;;  %s990_s21 = sphi %s1037_s21, %s1280_s21   ;;  %s986_s20 = sphi %s1035_s20, %s1279_s20   ;;  %s982_s19 = sphi %s1033_s19, %s1283_s19   ;;  %s978_s18 = sphi %s1031_s18, %s1282_s18  }
  0x10   : > { %1263 = sst [smem:[#allocation19_spill]] %s994_s22  ;;  %s645_s25 = sadd.s32 4294967294, %s998_s23  }
  0x11   : > { %1264 = sst [smem:[#allocation20_spill]] %s998_s23  ;;  %s43_s26 = sadd.s32 1, %s994_s22 }
  0x12   : > { %s52_s27 = sadd.s32 1, %s986_s20  ;;  %p45_p0 = scmp.ge.s32.totalorder %s43_s26, 2 }
  0x13   : > { %p59_p1 = scmp.ne.s32.totalorder %s986_s20, %s982_s19  ;;  %p60_p2 = scmp.eq.s32.totalorder %s998_s23, 0 }
  0x14   : > { %p65_p3 = scmp.ne.s32.totalorder %s982_s19, %s978_s18  ;;  %s1285_s26 = smov (%p45_p0, %s43_s26), 0 }
  0x15   : > { %1265 = sst [smem:[#allocation21_spill]] %s1285_s26  ;;  %p1074_p4 = por %p60_p2, %p59_p1 }
  0x16   : > { %p66_p5 = scmp.eq.s32.totalorder %s1062_s24, 0  ;;  %s47_s29 = ssub.s32 %s994_s22, %s1285_s26 }
  0x17   : > { %p173_p6 = scmp.eq.s32.totalorder %s1062_s24, 1  ;;  %p50_p7 = scmp.eq.s32.totalorder %s47_s29, 0 }
  0x18   : > { %p1082_p8 = por %p66_p5, %p65_p3  ;;  %p179_p10 = scmp.eq.s32.totalorder %s645_s25, 1 }
  0x19   : > { %p1086_p9 = por %p173_p6, %p59_p1  ;;  %p647_p12 = scmp.ge.s32.totalorder %s998_s23, 2 }
  0x1a   : > { %s1091_s7 = scalar_select %p50_p7, %s986_s20, %s52_s27  }
  0x1b   : > { %p1093_p11 = por %p179_p10, %p65_p3  ;;  %p701_p13 = scmp.lt.s32.totalorder %s998_s23, 2 }
  0x1c   : > { %1269 = sst [smem:[#allocation22_spill]] %s1091_s7  ;;  %s1100_s9 = sand.u32 1, %s986_s20  }
  0x1d   : > { %s1270_s8 = scalar_select %p1093_p11, 1, 0 }
  0x1e   : > { %s1103_s10 = sshll.u32 %s1100_s9, 3  ;;  %s1106_s11 = sshll.u32 %s994_s22, 3 }
  0x1f   : > { %1271 = sst [smem:[#allocation23_spill]] %s1270_s8  ;;  %p1110_p0 = pnand %p701_p13, %p1074_p4 }
  0x20   : > { %s245_s13 = sand.u32 1, %s998_s23   ;;  %s1273_s1 = sld [smem:[#allocation25_spill]] }
  0x21   : > { %s249_s25 = scalar_lea.vmem [#allocation5], %s1103_s10  ;;  %s246_s28 = scalar_lea.sflag [#allocation6], %s245_s13 }
  0x22   : > { %s258_s27 = sshll.u32 %s249_s25, 4  ;;  %p656_p1 = scmp.ge.s32.totalorder %s998_s23, 1  ;;  %s259_s27 = int_to_ptr.vmem [resolvable:$true] %s258_s27 }
  0x23   : > { %p303_p2 = scmp.lt.s32.totalorder %s998_s23, 3  ;;  %s1275_s0 = sld [smem:[#allocation24_spill]] }
  0x24   : > { %s226_s13 = scalar_lea.sflag [#allocation3], %s1100_s9  ;;  %s274_s22 = scalar_lea.hbm %s1250_s2, %s1106_s11 }
  0x25   : > { %p1124_p3 = pnand %p656_p1, %p303_p2  ;;  %s276_s7 = sshll.u32 %s274_s22, 4  ;;  %s277_s7 = int_to_ptr.hbm [resolvable:$true] %s276_s7 }
  0x26   : > { %s254_s16 = scalar_lea.hbm %s1273_s1, %s1106_s11  ;;  %s229_s1 = scalar_lea.vmem [#allocation2], %s1103_s10 }
  0x27   : > { %s256_s17 = sshll.u32 %s254_s16, 4  ;;  %s238_s26 = sshll.u32 %s229_s1, 4  ;;  %s257_s17 = int_to_ptr.hbm [resolvable:$true] %s256_s17  ;;  %s239_s26 = int_to_ptr.vmem [resolvable:$true] %s238_s26 }
  0x28   : > { %687 = dma.hbm_to_vmem [thread:$0]  (!%p1110_p0), %s257_s17, 128, %s259_s27, %s246_s28  }
  0x29   : > { %s234_s16 = scalar_lea.hbm %s1275_s0, %s1106_s11  ;;  %s269_s20 = scalar_lea.vmem [#allocation7], %s1103_s10 }
  0x2a   : > { %s236_s25 = sshll.u32 %s234_s16, 4  ;;  %s278_s14 = sshll.u32 %s269_s20, 4  ;;  %s237_s25 = int_to_ptr.hbm [resolvable:$true] %s236_s25  ;;  %s279_s14 = int_to_ptr.vmem [resolvable:$true] %s278_s14 }
  0x2b   : > { %684 = dma.hbm_to_vmem [thread:$0]  (!%p1110_p0), %s237_s25, 128, %s239_s26, %s226_s13  }
  0x2c   : > { %690 = dma.hbm_to_vmem [thread:$0]  (!%p1110_p0), %s277_s7, 128, %s279_s14, %s246_s28  }
  0x2d   : > { %s294_s16 = scalar_lea.hbm %s1251_s3, %s1106_s11  ;;  %s289_s0 = scalar_lea.vmem [#allocation8], %s1103_s10 }
  0x2e   : > { %s298_s23 = sshll.u32 %s289_s0, 4  ;;  %s296_s8 = sshll.u32 %s294_s16, 4  ;;  %s299_s23 = int_to_ptr.vmem [resolvable:$true] %s298_s23  ;;  %s297_s8 = int_to_ptr.hbm [resolvable:$true] %s296_s8 }
  0x2f   : > { %s286_s26 = scalar_lea.sflag [#allocation9], %s1100_s9  ;;  %307 = sbr.rel (%p1124_p3) target bundleno = 106 (0x6a), region = 36 }
  0x30   : > { %693 = dma.hbm_to_vmem [thread:$0]  (!%p1110_p0), %s297_s8, 128, %s299_s23, %s286_s26  }
  0x31   : > { %s1154_s20 = sand.u32 (!%p1124_p3), 1, %s982_s19  }
  0x32   : > { %s1157_s22 = sshll.u32 (!%p1124_p3), %s1154_s20, 3  ;;  %s310_s7 = scalar_lea.sflag (!%p1124_p3), [#allocation3], %s1154_s20 }
  0x33   : > { %s313_s0 = scalar_lea.vmem (!%p1124_p3), [#allocation2], %s1157_s22 }
  0x34   : > { %957 = dma.done.wait (%p1082_p8), %s310_s7, 128  }
  0x35   : > { %959 = vsyncadd (%p1082_p8), %s310_s7, 4294967168  ;;  %s319_s23 = sand.u32 1, %s1062_s24   ;;  %s323_s9 = scalar_lea.vmem [#allocation5], %s1157_s22 }
  0x36   : > { %s320_s8 = scalar_lea.sflag [#allocation6], %s319_s23 }
  0x37   : > { %961 = dma.done.wait (%p1082_p8), %s320_s8, 256  }
  0x38   : > { %963 = vsyncadd (%p1082_p8), %s320_s8, 4294967040  ;;  %s333_s10 = scalar_lea.vmem [#allocation7], %s1157_s22  ;;  %s340_s11 = scalar_lea.sflag [#allocation9], %s1154_s20 }
  0x39   : > { %s343_s12 = scalar_lea.vmem [#allocation8], %s1157_s22 }
  0x3a   : > { %965 = dma.done.wait (%p1082_p8), %s340_s11, 128  }
  0x3b   : > { %967 = vsyncadd (%p1082_p8), %s340_s11, 4294967168  ;;  %v391_v0 = vld [vmem:[%s313_s0] sm:$0xff]  ;;  %vm418_vm0 = vcmask 261120   ;;  %s1179_s24 = scalar_lea.vmem [#allocation10], %s1157_s22  ;;  %v1000_v2 = vmov 0.0   ;;  %s665_s28 = sshll.u32 %s990_s21, 3 }
  0x3c   : > { %v394_v1 = vand.u32 2147483647, %v391_v0  ;;  %419 = vst.msk [vmem:[%s1179_s24] sm:$0xff] %vm418_vm0, %v1000_v2  ;;  %s390_s29 = scalar_lea.vmem [#allocation11], %s1157_s22  ;;  %s458_s13 = scalar_lea.hbm %s1253_s5, %s665_s28  ;;  %v410_v5 = vld [vmem:[%s333_s10] sm:$0xff]  ;;  %v411_v6 = vld [vmem:[%s343_s12] sm:$0xff] }
  0x3d   : > { %420 = vst.msk [vmem:[%s390_s29] sm:$0xff] %vm418_vm0, %v1000_v2  ;;  %s460_s17 = sshll.u32 %s390_s29, 4  ;;  %s462_s27 = sshll.u32 %s458_s13, 4  ;;  %v412_v7 = vmul.f32 %v411_v6, %v410_v5  ;;  %s461_s17 = int_to_ptr.vmem [resolvable:$true] %s460_s17  ;;  %s463_s27 = int_to_ptr.hbm [resolvable:$true] %s462_s27 }
  0x3e   : > { %v395_v3 = vsub.f32 0.0, %v394_v1  ;;  %s434_s14 = scalar_lea.sflag [#allocation12], %s1154_s20  ;;  %s890_s15 = sshra.s32 %s463_s27, 4  ;;  %s891_s15 = int_to_ptr.hbm [resolvable:$true] %s890_s15 }
  0x3f   : > { %s892_s1 = scalar_lea.hbm %s891_s15, 8  ;;  %s896_s7 = scalar_lea.hbm %s1253_s5, 16 }
  0x40   : > { %v396_v4 = vmul.f32 1.442695, %v395_v3  ;;  %p893_p4 = scmp.ne.s32.totalorder %s891_s15, %s892_s1  ;;  %p897_p7 = scmp.lt.s32.totalorder %s891_s15, %s1253_s5 }
  0x41   : > { %p898_p8 = scmp.lt.s32.totalorder %s896_s7, %s892_s1 }
  0x42   : > { %752 = vpow2.f32 %v396_v4  ;;  %p894_p5 = pnand %p893_p4, %p1086_p9 }
  0x43   : > { %p899_p10 = por %p898_p8, %p897_p7 }
  0x44   : > { %v425_v8 = vld [vmem:[%s390_s29] sm:$0xff]  ;;  %p895_p6 = pneg %p894_p5 }
  0x45   : > { %v426_v9 = vadd.f32 %v425_v8, %v412_v7 }
  0x46   : > { %p900_p13 = pnand %p899_p10, %p895_p6 }
  0x47   : > { %427 = vst.msk [vmem:[%s390_s29] sm:$0xff] %vm418_vm0, %v426_v9 }
  0x48   : > { %v753_v10 = vpop.eup %752 }
  0x49   : > { %903 = shalt.err (!%p900_p13)
}
  0x4a   : > { %678 = dma.vmem_to_hbm [thread:$0]  (%p1086_p9), %s461_s17, 128, %s463_s27, %s434_s14   ;;  %v398_v11 = vadd.f32 1.0, %v753_v10  ;;  %v393_v12 = vmax.f32 %v391_v0, 0.0  ;;  %v392_v20 = vld [vmem:[%s323_s9] sm:$0xff]  ;;  %v421_v25 = vld [vmem:[%s1179_s24] sm:$0xff] }
  0x4b   : > { %s444_s11 = scalar_lea.hbm %s1252_s4, %s665_s28  ;;  %s446_s12 = sshll.u32 %s1179_s24, 4  ;;  %s447_s12 = int_to_ptr.vmem [resolvable:$true] %s446_s12 }
  0x4c   : > { %754 = vlog2.f32 %v398_v11  ;;  %s448_s29 = sshll.u32 %s444_s11, 4  ;;  %s429_s22 = scalar_lea.sflag [#allocation4], %s1154_s20  ;;  %s449_s29 = int_to_ptr.hbm [resolvable:$true] %s448_s29 }
  0x4d   : > { %s918_s9 = sshra.s32 %s449_s29, 4  ;;  %s924_s25 = scalar_lea.hbm %s1252_s4, 16  ;;  %s919_s9 = int_to_ptr.hbm [resolvable:$true] %s918_s9 }
  0x4e   : > { %s920_s30 = scalar_lea.hbm %s919_s9, 8  ;;  %p925_p3 = scmp.lt.s32.totalorder %s919_s9, %s1252_s4 }
  0x4f   : > { %p921_p0 = scmp.ne.s32.totalorder %s919_s9, %s920_s30  ;;  %p926_p4 = scmp.lt.s32.totalorder %s924_s25, %s920_s30 }
  0x51   : > { %p922_p1 = pnand %p921_p0, %p1086_p9  ;;  %p927_p5 = por %p926_p4, %p925_p3 }
  0x52   : > { %v755_v13 = vpop.eup %754 }
  0x53   : > { %v400_v14 = vmul.f32 0.6931472, %v755_v13  ;;  %p923_p2 = pneg %p922_p1 }
  0x55   : > { %v401_v15 = vadd.f32 %v400_v14, %v393_v12  ;;  %p928_p6 = pnand %p927_p5, %p923_p2 }
  0x57   : > { %v402_v16 = vsub.f32 %v391_v0, %v401_v15  ;;  %v404_v17 = vsub.f32 0.0, %v401_v15 }
  0x59   : > { %v403_v18 = vmax.f32 %v402_v16, -18.420681  ;;  %v405_v19 = vmax.f32 %v404_v17, -18.420681 }
  0x5b   : > { %v406_v21 = vsub.f32 %v403_v18, %v405_v19 }
  0x5d   : > { %v407_v22 = vmul.f32 %v406_v21, %v392_v20 }
  0x5f   : > { %v408_v23 = vadd.f32 %v407_v22, %v405_v19 }
  0x61   : > { %v409_v24 = vsub.f32 0.0, %v408_v23 }
  0x63   : > { %v413_v26 = vmul.f32 %v412_v7, %v409_v24 }
  0x65   : > { %v422_v27 = vadd.f32 %v421_v25, %v413_v26 }
  0x67   : > { %424 = vst.msk [vmem:[%s1179_s24] sm:$0xff] %vm418_vm0, %v422_v27 }
  0x68   : > { %931 = shalt.err (!%p928_p6)
}
  0x69   : > { %677 = dma.vmem_to_hbm [thread:$0]  (%p1086_p9), %s447_s12, 128, %s449_s29, %s429_s22  }
  0x6a PF: > { %s1277_s24 = sld [smem:[#allocation20_spill]]  ;;  %s474_s27 = sand.u32 1, %s978_s18  }
  0x6b   : > { %p695_p7 = pnand %p647_p12, %p1093_p11  ;;  %s475_s14 = scalar_lea.sflag [#allocation4], %s474_s27 }
  0x6d   : > { %p696_p8 = pneg %p695_p7 }
  0x6f   : > { %969 = dma.done.wait (%p696_p8), %s475_s14, 128  }
  0x70   : > { %971 = vsyncadd (%p696_p8), %s475_s14, 4294967168  ;;  %s485_s15 = scalar_lea.sflag [#allocation12], %s474_s27 }
  0x71   : > { %973 = dma.done.wait (%p696_p8), %s485_s15, 128  }
  0x72   : > { %975 = vsyncadd (%p696_p8), %s485_s15, 4294967168  ;;  %s31_s23 = sadd.s32 1, %s1277_s24   ;;  %s1278_s6 = sld [smem:[#allocation18_spill]] }
  0x73   : > { %p28_p10 = scmp.ge.s32.totalorder %s31_s23, 4   ;;  %s1279_s20 = sld [smem:[#allocation22_spill]] }
  0x74   : > { %s1280_s21 = sld [smem:[#allocation19_spill]]  ;;  %s1282_s18 = smov %s982_s19 }
  0x75   : > { %s1281_s22 = sld [smem:[#allocation21_spill]]  ;;  %30 = sbr.rel (!%p28_p10) target bundleno = 15 (0xf), region = 139 }
  0x78   : > { %s1283_s19 = smov %s1278_s6 }
  0x7a   :  { %491 = vsyncpa [#allocation3], 1 }
  0x7b   :  { %493 = vsyncpa [#allocation3 + $0x1], 1 }
  0x7c   :  { %494 = vsyncpa [#allocation6], 1 }
  0x7d   :  { %496 = vsyncpa [#allocation6 + $0x1], 1 }
  0x7e   :  { %497 = vsyncpa [#allocation9], 1 }
  0x7f   :  { %499 = vsyncpa [#allocation9 + $0x1], 1 }
  0x80   :  { %500 = vsyncpa [#allocation4], 1 }
  0x81   :  { %502 = vsyncpa [#allocation4 + $0x1], 1 }
  0x82   :  { %503 = vsyncpa [#allocation12], 1 }
  0x83   :  { %505 = vsyncpa [#allocation12 + $0x1], 1 }

</bundles_post_ra>
